<compile_context>
chip_gen: v5e
topology: v5e:2x2
jax: 0.10.0
libtpu: 0.0.40
codegen_flags: <defaults>
</compile_context>

<pallas_src>
import jax
import jax.numpy as jnp
from jax.experimental import pallas as pl
from jax.experimental.pallas import tpu as pltpu

M_VIEWS = 100            # fixed by the module: in_dim = 100 * 3
N_LAYERS = 3
WIDTH = 128
IN_DIM = M_VIEWS * 3     # 300
IN_DIM_PAD = 384         # next multiple of 128
OUT_DIM = 3
OUT_PAD = 128            # lane-dense output width
TN_MAX = 1024            # rows (points) per grid step


def _round_up(x, m):
    return ((x + m - 1) // m) * m


def posterior_kernel(x_ref,
                     w0_ref, b0_ref,
                     w1_ref, b1_ref,
                     w2_ref, b2_ref,
                     w3_ref, b3_ref,
                     o_ref):
    # x_ref: (TN, 384) bf16, already masked + zero-padded in K.
    h = x_ref[...]
    # layer 0: (TN, 384) @ (384, 128), f32 accumulate, +bias, relu
    h = jnp.dot(h, w0_ref[...], preferred_element_type=jnp.float32) + b0_ref[...]
    h = jnp.maximum(h, 0.0).astype(jnp.bfloat16)
    # layer 1
    h = jnp.dot(h, w1_ref[...], preferred_element_type=jnp.float32) + b1_ref[...]
    h = jnp.maximum(h, 0.0).astype(jnp.bfloat16)
    # layer 2
    h = jnp.dot(h, w2_ref[...], preferred_element_type=jnp.float32) + b2_ref[...]
    h = jnp.maximum(h, 0.0).astype(jnp.bfloat16)
    # out_linear, padded to 128 lanes so the store is lane-dense (cols 3.. are 0)
    o_ref[...] = (jnp.dot(h, w3_ref[...], preferred_element_type=jnp.float32)
                  + b3_ref[...]).astype(o_ref.dtype)


def posterior_forward(x, rgb_all, dirs_all, mask_all, params, *, tn_max=TN_MAX):
    """x: (N,3), rgb_all: (M,N,3), dirs_all: (M,N,3) [unused], mask_all: (M,N) bool."""
    del x, dirs_all  # unused in the PyTorch forward
    M, N, _ = rgb_all.shape
    assert M == M_VIEWS, "module hard-codes in_dim = 100*3"

    # Tile over points: big tiles amortize pipeline overhead & feed the MXU;
    # keep a multiple of 16 (bf16 sublane packing) and don't over-pad tiny N.
    tn = min(tn_max, _round_up(N, 16))
    n_pad = _round_up(N, tn)

    # Fused glue: NaN-safe mask, permute(1,0,2).reshape(N, 300), pad K to 384,
    # pad rows to n_pad, cast bf16.  One XLA fusion -> one (n_pad, 384) bf16 slab.
    rgb = jnp.where(mask_all[..., None], rgb_all, 0.0)
    inputs = jnp.transpose(rgb, (1, 0, 2)).reshape(N, IN_DIM)
    inputs = jnp.pad(inputs, ((0, n_pad - N), (0, IN_DIM_PAD - IN_DIM)))
    inputs = inputs.astype(jnp.bfloat16)

    (w0, b0), (w1, b1), (w2, b2), (w3, b3) = params
    # Pad weights to MXU-friendly shapes; weights bf16, biases f32.
    w0p = jnp.pad(w0, ((0, IN_DIM_PAD - IN_DIM), (0, 0))).astype(jnp.bfloat16)
    w1p = w1.astype(jnp.bfloat16)
    w2p = w2.astype(jnp.bfloat16)
    w3p = jnp.pad(w3, ((0, 0), (0, OUT_PAD - OUT_DIM))).astype(jnp.bfloat16)
    b0p, b1p, b2p = b0, b1, b2
    b3p = jnp.pad(b3, ((0, 0), (0, OUT_PAD - OUT_DIM)))

    full = lambda shape: pl.BlockSpec(shape, lambda i: (0, 0))
    grid = (n_pad // tn,)

    out = pl.pallas_call(
        posterior_kernel,
        out_shape=jax.ShapeDtypeStruct((n_pad, OUT_PAD), jnp.float32),
        grid_spec=pltpu.PrefetchScalarGridSpec(
            num_scalar_prefetch=0,
            grid=grid,
            in_specs=[
                pl.BlockSpec((tn, IN_DIM_PAD), lambda i: (i, 0)),   # masked inputs tile
                full((IN_DIM_PAD, WIDTH)), full((1, WIDTH)),        # layer 0
                full((WIDTH, WIDTH)),      full((1, WIDTH)),        # layer 1
                full((WIDTH, WIDTH)),      full((1, WIDTH)),        # layer 2
                full((WIDTH, OUT_PAD)),    full((1, OUT_PAD)),      # out_linear (padded)
            ],
            out_specs=pl.BlockSpec((tn, OUT_PAD), lambda i: (i, 0)),
        ),
        compiler_params=pltpu.CompilerParams(
            dimension_semantics=("parallel",),
            vmem_limit_bytes=32 * 1024 * 1024,
        ),
    )(inputs, w0p, b0p, w1p, b1p, w2p, b2p, w3p, b3p)

    # Strip row padding and the lane-dense output padding.
    return out[:N, :OUT_DIM]


def init_params(key):
    """Deterministic synthetic parameters (PyTorch Linear shapes, stored transposed)."""
    dims = [(IN_DIM, WIDTH), (WIDTH, WIDTH), (WIDTH, WIDTH), (WIDTH, OUT_DIM)]
    params = []
    for (din, dout) in dims:
        key, kw, kb = jax.random.split(key, 3)
        bound = 1.0 / jnp.sqrt(din)
        w = jax.random.uniform(kw, (din, dout), jnp.float32, -bound, bound)
        b = jax.random.uniform(kb, (1, dout), jnp.float32, -bound, bound)
        params.append((w, b))
    return params


def posterior_reference(rgb_all, mask_all, params):
    """Pure-JAX reference mirroring the PyTorch forward with the same bf16/f32
    mixed-precision strategy as the kernel (bf16 operands, f32 accumulation)."""
    M, N, _ = rgb_all.shape
    rgb = jnp.where(mask_all[..., None], rgb_all, 0.0)
    h = jnp.transpose(rgb, (1, 0, 2)).reshape(N, M * 3)
    for i, (w, b) in enumerate(params):
        h = jnp.dot(h.astype(jnp.bfloat16), w.astype(jnp.bfloat16),
                    preferred_element_type=jnp.float32) + b
        if i < len(params) - 1:
            h = jnp.maximum(h, 0.0)
    return h


if __name__ == "__main__":
    key = jax.random.PRNGKey(0)
    k_params, k_x, k_rgb, k_dirs, k_mask = jax.random.split(key, 5)

    N = 64  # small number of points; M is fixed to 100 by the module's in_dim
    params = init_params(k_params)

    x = jax.random.normal(k_x, (N, 3), jnp.float32)
    rgb_all = jax.random.uniform(k_rgb, (M_VIEWS, N, 3), jnp.float32)
    dirs_all = jax.random.normal(k_dirs, (M_VIEWS, N, 3), jnp.float32)
    mask_all = jax.random.uniform(k_mask, (M_VIEWS, N)) > 0.3

    out = posterior_forward(x, rgb_all, dirs_all, mask_all, params)
    out = jax.block_until_ready(out)

    ref = posterior_reference(rgb_all, mask_all, params)
    assert out.shape == (N, OUT_DIM)
    if not jnp.allclose(out, ref, atol=2e-3, rtol=2e-3):
        raise AssertionError("Pallas output does not match reference")

    print("KERNEL_OK")
</pallas_src>

<mosaic_0001>
module attributes {stable_mosaic.version = 11 : i64} {
  func.func @posterior_kernel(%arg0: i32, %arg1: memref<64x384xbf16, #tpu.memory_space<vmem>>, %arg2: memref<384x128xbf16, #tpu.memory_space<vmem>>, %arg3: memref<1x128xf32, #tpu.memory_space<vmem>>, %arg4: memref<128x128xbf16, #tpu.memory_space<vmem>>, %arg5: memref<1x128xf32, #tpu.memory_space<vmem>>, %arg6: memref<128x128xbf16, #tpu.memory_space<vmem>>, %arg7: memref<1x128xf32, #tpu.memory_space<vmem>>, %arg8: memref<128x128xbf16, #tpu.memory_space<vmem>>, %arg9: memref<1x128xf32, #tpu.memory_space<vmem>>, %arg10: memref<64x128xf32, #tpu.memory_space<vmem>>) attributes {dimension_semantics = [#tpu.dimension_semantics<parallel>], iteration_bounds = array<i64: 1>, scalar_prefetch = 0 : i64, scratch_operands = 0 : i64, tpu.core_type = #tpu.core_type<tc>, window_params = [{transform_indices = @transform_0, window_bounds = array<i64: 64, 384>}, {pipeline_mode = #tpu.pipeline_mode<synchronous>, transform_indices = @transform_1, window_bounds = array<i64: 384, 128>}, {pipeline_mode = #tpu.pipeline_mode<synchronous>, transform_indices = @transform_2, window_bounds = array<i64: 1, 128>}, {pipeline_mode = #tpu.pipeline_mode<synchronous>, transform_indices = @transform_3, window_bounds = array<i64: 128, 128>}, {pipeline_mode = #tpu.pipeline_mode<synchronous>, transform_indices = @transform_4, window_bounds = array<i64: 1, 128>}, {pipeline_mode = #tpu.pipeline_mode<synchronous>, transform_indices = @transform_5, window_bounds = array<i64: 128, 128>}, {pipeline_mode = #tpu.pipeline_mode<synchronous>, transform_indices = @transform_6, window_bounds = array<i64: 1, 128>}, {pipeline_mode = #tpu.pipeline_mode<synchronous>, transform_indices = @transform_7, window_bounds = array<i64: 128, 128>}, {pipeline_mode = #tpu.pipeline_mode<synchronous>, transform_indices = @transform_8, window_bounds = array<i64: 1, 128>}, {transform_indices = @transform_9, window_bounds = array<i64: 64, 128>}]} {
    %c0 = arith.constant 0 : index
    %c0_0 = arith.constant 0 : index
    %0 = vector.load %arg1[%c0, %c0_0] : memref<64x384xbf16, #tpu.memory_space<vmem>>, vector<64x384xbf16>
    %c0_1 = arith.constant 0 : index
    %c0_2 = arith.constant 0 : index
    %1 = vector.load %arg2[%c0_1, %c0_2] : memref<384x128xbf16, #tpu.memory_space<vmem>>, vector<384x128xbf16>
    %cst = arith.constant dense<0.000000e+00> : vector<64x128xf32>
    %2 = tpu.matmul %0, %1, %cst {dimension_numbers = #tpu.dot_dimension_numbers<[1], [0], [0], [1], [0, 0, 1, 1], [], []>} : vector<64x384xbf16>, vector<384x128xbf16>, vector<64x128xf32> -> vector<64x128xf32>
    %c0_3 = arith.constant 0 : index
    %c0_4 = arith.constant 0 : index
    %3 = vector.load %arg3[%c0_3, %c0_4] : memref<1x128xf32, #tpu.memory_space<vmem>>, vector<1x128xf32>
    %4 = vector.broadcast %3 : vector<1x128xf32> to vector<64x128xf32>
    %5 = arith.addf %2, %4 : vector<64x128xf32>
    %cst_5 = arith.constant 0.000000e+00 : f32
    %6 = vector.broadcast %cst_5 : f32 to vector<64x128xf32>
    %7 = arith.maximumf %5, %6 : vector<64x128xf32>
    %8 = arith.truncf %7 : vector<64x128xf32> to vector<64x128xbf16>
    %c0_6 = arith.constant 0 : index
    %c0_7 = arith.constant 0 : index
    %9 = vector.load %arg4[%c0_6, %c0_7] : memref<128x128xbf16, #tpu.memory_space<vmem>>, vector<128x128xbf16>
    %cst_8 = arith.constant dense<0.000000e+00> : vector<64x128xf32>
    %10 = tpu.matmul %8, %9, %cst_8 {dimension_numbers = #tpu.dot_dimension_numbers<[1], [0], [0], [1], [0, 0, 1, 1], [], []>} : vector<64x128xbf16>, vector<128x128xbf16>, vector<64x128xf32> -> vector<64x128xf32>
    %c0_9 = arith.constant 0 : index
    %c0_10 = arith.constant 0 : index
    %11 = vector.load %arg5[%c0_9, %c0_10] : memref<1x128xf32, #tpu.memory_space<vmem>>, vector<1x128xf32>
    %12 = vector.broadcast %11 : vector<1x128xf32> to vector<64x128xf32>
    %13 = arith.addf %10, %12 : vector<64x128xf32>
    %cst_11 = arith.constant 0.000000e+00 : f32
    %14 = vector.broadcast %cst_11 : f32 to vector<64x128xf32>
    %15 = arith.maximumf %13, %14 : vector<64x128xf32>
    %16 = arith.truncf %15 : vector<64x128xf32> to vector<64x128xbf16>
    %c0_12 = arith.constant 0 : index
    %c0_13 = arith.constant 0 : index
    %17 = vector.load %arg6[%c0_12, %c0_13] : memref<128x128xbf16, #tpu.memory_space<vmem>>, vector<128x128xbf16>
    %cst_14 = arith.constant dense<0.000000e+00> : vector<64x128xf32>
    %18 = tpu.matmul %16, %17, %cst_14 {dimension_numbers = #tpu.dot_dimension_numbers<[1], [0], [0], [1], [0, 0, 1, 1], [], []>} : vector<64x128xbf16>, vector<128x128xbf16>, vector<64x128xf32> -> vector<64x128xf32>
    %c0_15 = arith.constant 0 : index
    %c0_16 = arith.constant 0 : index
    %19 = vector.load %arg7[%c0_15, %c0_16] : memref<1x128xf32, #tpu.memory_space<vmem>>, vector<1x128xf32>
    %20 = vector.broadcast %19 : vector<1x128xf32> to vector<64x128xf32>
    %21 = arith.addf %18, %20 : vector<64x128xf32>
    %cst_17 = arith.constant 0.000000e+00 : f32
    %22 = vector.broadcast %cst_17 : f32 to vector<64x128xf32>
    %23 = arith.maximumf %21, %22 : vector<64x128xf32>
    %24 = arith.truncf %23 : vector<64x128xf32> to vector<64x128xbf16>
    %c0_18 = arith.constant 0 : index
    %c0_19 = arith.constant 0 : index
    %25 = vector.load %arg8[%c0_18, %c0_19] : memref<128x128xbf16, #tpu.memory_space<vmem>>, vector<128x128xbf16>
    %cst_20 = arith.constant dense<0.000000e+00> : vector<64x128xf32>
    %26 = tpu.matmul %24, %25, %cst_20 {dimension_numbers = #tpu.dot_dimension_numbers<[1], [0], [0], [1], [0, 0, 1, 1], [], []>} : vector<64x128xbf16>, vector<128x128xbf16>, vector<64x128xf32> -> vector<64x128xf32>
    %c0_21 = arith.constant 0 : index
    %c0_22 = arith.constant 0 : index
    %27 = vector.load %arg9[%c0_21, %c0_22] : memref<1x128xf32, #tpu.memory_space<vmem>>, vector<1x128xf32>
    %28 = vector.broadcast %27 : vector<1x128xf32> to vector<64x128xf32>
    %29 = arith.addf %26, %28 : vector<64x128xf32>
    %c0_23 = arith.constant 0 : index
    %c0_24 = arith.constant 0 : index
    %30 = vector.load %arg10[%c0_23, %c0_24] : memref<64x128xf32, #tpu.memory_space<vmem>>, vector<64x128xf32>
    tpu.vector_store %arg10[%c0_23, %c0_24], %29 {strides = array<i32>} : memref<64x128xf32, #tpu.memory_space<vmem>>, vector<64x128xf32>,
    return
  }
  func.func @transform_0(%arg0: i32) -> (i32, i32) {
    %c0_i32 = arith.constant 0 : i32
    %c0_i32_0 = arith.constant 0 : i32
    return %arg0, %c0_i32 : i32, i32
  }
  func.func @transform_1(%arg0: i32) -> (i32, i32) {
    %c0_i32 = arith.constant 0 : i32
    %c0_i32_0 = arith.constant 0 : i32
    %c0_i32_1 = arith.constant 0 : i32
    return %c0_i32, %c0_i32_0 : i32, i32
  }
  func.func @transform_2(%arg0: i32) -> (i32, i32) {
    %c0_i32 = arith.constant 0 : i32
    %c0_i32_0 = arith.constant 0 : i32
    %c0_i32_1 = arith.constant 0 : i32
    return %c0_i32, %c0_i32_0 : i32, i32
  }
  func.func @transform_3(%arg0: i32) -> (i32, i32) {
    %c0_i32 = arith.constant 0 : i32
    %c0_i32_0 = arith.constant 0 : i32
    %c0_i32_1 = arith.constant 0 : i32
    return %c0_i32, %c0_i32_0 : i32, i32
  }
  func.func @transform_4(%arg0: i32) -> (i32, i32) {
    %c0_i32 = arith.constant 0 : i32
    %c0_i32_0 = arith.constant 0 : i32
    %c0_i32_1 = arith.constant 0 : i32
    return %c0_i32, %c0_i32_0 : i32, i32
  }
  func.func @transform_5(%arg0: i32) -> (i32, i32) {
    %c0_i32 = arith.constant 0 : i32
    %c0_i32_0 = arith.constant 0 : i32
    %c0_i32_1 = arith.constant 0 : i32
    return %c0_i32, %c0_i32_0 : i32, i32
  }
  func.func @transform_6(%arg0: i32) -> (i32, i32) {
    %c0_i32 = arith.constant 0 : i32
    %c0_i32_0 = arith.constant 0 : i32
    %c0_i32_1 = arith.constant 0 : i32
    return %c0_i32, %c0_i32_0 : i32, i32
  }
  func.func @transform_7(%arg0: i32) -> (i32, i32) {
    %c0_i32 = arith.constant 0 : i32
    %c0_i32_0 = arith.constant 0 : i32
    %c0_i32_1 = arith.constant 0 : i32
    return %c0_i32, %c0_i32_0 : i32, i32
  }
  func.func @transform_8(%arg0: i32) -> (i32, i32) {
    %c0_i32 = arith.constant 0 : i32
    %c0_i32_0 = arith.constant 0 : i32
    %c0_i32_1 = arith.constant 0 : i32
    return %c0_i32, %c0_i32_0 : i32, i32
  }
  func.func @transform_9(%arg0: i32) -> (i32, i32) {
    %c0_i32 = arith.constant 0 : i32
    %c0_i32_0 = arith.constant 0 : i32
    return %arg0, %c0_i32 : i32, i32
  }
}

</mosaic_0001>

<bundles_post_ra>
// kernel: tpu_custom_call.1
= control target key start
LH: loop header
LB: loop body
LE: loop exit
PB: predicated region body
PF: predicated region fallthrough
CT: control target
= control target key end

     0   :  { %14 = vsyncpa [#allocation3], 0  ;;  %s1418_s0 = inlined_call_operand.hbm [shape: bf16[64,384], index: 0, kind: input, shape index: {}]   ;;  %s1419_s1 = inlined_call_operand.hbm [shape: bf16[384,128], index: 1, kind: input, shape index: {}]   ;;  %s1420_s2 = inlined_call_operand.vmem [shape: f32[1,128], index: 2, kind: input, shape index: {}]   ;;  %s1421_s3 = inlined_call_operand.hbm [shape: bf16[128,128], index: 3, kind: input, shape index: {}]   ;;  %s1422_s4 = inlined_call_operand.vmem [shape: f32[1,128], index: 4, kind: input, shape index: {}]   ;;  %s1423_s5 = inlined_call_operand.hbm [shape: bf16[128,128], index: 5, kind: input, shape index: {}]   ;;  %s1424_s6 = inlined_call_operand.vmem [shape: f32[1,128], index: 6, kind: input, shape index: {}]   ;;  %s1425_s7 = inlined_call_operand.hbm [shape: bf16[128,128], index: 7, kind: input, shape index: {}]   ;;  %s1426_s8 = inlined_call_operand.vmem [shape: f32[1,128], index: 8, kind: input, shape index: {}]   ;;  %s1427_s9 = inlined_call_operand.hbm [shape: f32[64,128], index: 9, kind: output, shape index: {}]  }
   0x1   :  { %15 = vsyncpa [#allocation6], 0 }
   0x2   :  { %16 = vsyncpa [#allocation9], 0  ;;  %s35_s11 = sshll.u32 %s1419_s1, 4  ;;  %s36_s11 = int_to_ptr.hbm [resolvable:$true] %s35_s11 }
   0x3   :  { %17 = vsyncpa [#allocation4], 0  ;;  %s1314_s12 = smov [#allocation5]   ;;  %s65_s16 = sshll.u32 %s1423_s5, 4  ;;  %s66_s16 = int_to_ptr.hbm [resolvable:$true] %s65_s16 }
   0x4   :  { %s37_s13 = sshll.u32 %s1314_s12, 4  ;;  %s1315_s17 = smov 64   ;;  %s38_s13 = int_to_ptr.vmem [resolvable:$true] %s37_s13 }
   0x5   :  { %s1316_s18 = smov 4   ;;  %s1317_s19 = smov [#allocation8]  }
   0x6   :  { %43 = dma.hbm_to_vmem [thread:$0]  %s36_s11, 3072, %s38_s13, [#allocation6], %s1315_s17, %s1315_s17, %s1316_s18  }
   0x7   :  { %s67_s20 = sshll.u32 %s1317_s19, 4  ;;  %s22_s22 = sshll.u32 %s1418_s0, 4  ;;  %s68_s20 = int_to_ptr.vmem [resolvable:$true] %s67_s20  ;;  %s23_s22 = int_to_ptr.hbm [resolvable:$true] %s22_s22 }
   0x8   :  { %73 = dma.hbm_to_vmem [thread:$0]  %s66_s16, 1024, %s68_s20, [#allocation9], %s1315_s17, %s1315_s17, %s1316_s18  }
   0x9   :  { %s1318_s5 = smov [#allocation2]   ;;  %s50_s26 = sshll.u32 %s1421_s3, 4  ;;  %s51_s26 = int_to_ptr.hbm [resolvable:$true] %s50_s26 }
   0xa   :  { %s24_s23 = sshll.u32 %s1318_s5, 4  ;;  %s1319_s27 = smov 192   ;;  %s25_s23 = int_to_ptr.vmem [resolvable:$true] %s24_s23 }
   0xb   :  { %s1320_s28 = smov 12   ;;  %s1321_s29 = smov [#allocation7]  }
   0xc   :  { %30 = dma.hbm_to_vmem [thread:$0]  %s23_s22, 1536, %s25_s23, [#allocation3], %s1319_s27, %s1319_s27, %s1320_s28  }
   0xd   :  { %s52_s30 = sshll.u32 %s1321_s29, 4  ;;  %s80_s11 = sshll.u32 %s1425_s7, 4  ;;  %s53_s30 = int_to_ptr.vmem [resolvable:$true] %s52_s30  ;;  %s81_s11 = int_to_ptr.hbm [resolvable:$true] %s80_s11 }
   0xe   :  { %58 = dma.hbm_to_vmem [thread:$0]  %s51_s26, 1024, %s53_s30, [#allocation6], %s1315_s17, %s1315_s17, %s1316_s18  }
   0xf   :  { %s1322_s12 = smov [#allocation10]  }
  0x10   :  { %s82_s13 = sshll.u32 %s1322_s12, 4  ;;  %s83_s13 = int_to_ptr.vmem [resolvable:$true] %s82_s13 }
  0x11   :  { %88 = dma.hbm_to_vmem [thread:$0]  %s81_s11, 1024, %s83_s13, [#allocation9], %s1315_s17, %s1315_s17, %s1316_s18  }
  0x12   :  { %1306 = dma.done.wait [#allocation3], 1536  }
  0x13   :  { %1307 = vsyncadd [#allocation3], 4294965760 }
  0x14   :  { %1308 = dma.done.wait [#allocation6], 4096  }
  0x15   :  { %1309 = vsyncadd [#allocation6], 4294963200 }
  0x16   :  { %1310 = dma.done.wait [#allocation9], 2048  }
  0x17   :  { %1311 = vsyncadd [#allocation9], 4294965248  ;;  %v1089_v0 = vld [vmem:[#allocation5 + $0x38] sm:$0xff]  ;;  %v1088_v2 = vld [vmem:[#allocation5 + $0x30] sm:$0xff]  ;;  %s815_s20 = sshll.u32 %s1427_s9, 4  ;;  %s1324_s21 = smov 128   ;;  %s816_s20 = int_to_ptr.hbm [resolvable:$true] %s815_s20 }
  0x18   :  { %v1097_v1 = vld [vmem:[#allocation5 + $0x78] sm:$0xff]  ;;  %1130 = vmatpush.bf16.msra.mxu2 %v1089_v0  ;;  %v1096_v3 = vld [vmem:[#allocation5 + $0x70] sm:$0xff]  ;;  %387 = vmatpush.bf16.msra.mxu0 %v1089_v0  ;;  %v1087_v4 = vld [vmem:[#allocation5 + $0x28] sm:$0xff]  ;;  %s1325_s1 = smov 8  }
  0x19   :  { %1138 = vmatpush.bf16.msra.mxu3 %v1097_v1  ;;  %416 = vmatpush.bf16.msra.mxu1 %v1097_v1  ;;  %v1095_v5 = vld [vmem:[#allocation5 + $0x68] sm:$0xff]  ;;  %v1086_v6 = vld [vmem:[#allocation5 + $0x20] sm:$0xff]  ;;  %v1085_v8 = vld [vmem:[#allocation5 + $0x18] sm:$0xff] }
  0x1a   :  { %v1094_v7 = vld [vmem:[#allocation5 + $0x60] sm:$0xff]  ;;  %v1093_v9 = vld [vmem:[#allocation5 + $0x58] sm:$0xff]  ;;  %v1084_v10 = vld [vmem:[#allocation5 + $0x10] sm:$0xff] }
  0x1b   :  { %v1092_v11 = vld [vmem:[#allocation5 + $0x50] sm:$0xff]  ;;  %v1083_v12 = vld [vmem:[#allocation5 + $0x8] sm:$0xff]  ;;  %v1082_v14 = vld [vmem:[#allocation5] sm:$0xff] }
  0x1c   :  { %1131 = vmatpush.bf16.msra.mxu2 %v1088_v2  ;;  %388 = vmatpush.bf16.msra.mxu0 %v1088_v2  ;;  %v1091_v13 = vld [vmem:[#allocation5 + $0x48] sm:$0xff]  ;;  %v1090_v15 = vld [vmem:[#allocation5 + $0x40] sm:$0xff]  ;;  %v856_v16 = vld [vmem:[#allocation2 + $0x30] sm:$0xf] }
  0x1d   :  { %1139 = vmatpush.bf16.msra.mxu3 %v1096_v3  ;;  %417 = vmatpush.bf16.msra.mxu1 %v1096_v3  ;;  %v1077_v17 = vld [vmem:[#allocation2 + $0x38] sm:$0xf0]  ;;  %v1076_v18 = vld [vmem:[#allocation2 + $0x34] sm:$0xf]  ;;  %v858_v19 = vld [vmem:[#allocation2 + $0x3c] sm:$0xf0] }
  0x1e   :  { %v1105_v20 = vld [vmem:[#allocation5 + $0xb8] sm:$0xff]  ;;  %v832_v21 = vld [vmem:[#allocation2] sm:$0xf]  ;;  %v1071_v22 = vld [vmem:[#allocation2 + $0x8] sm:$0xf0]  ;;  %v857_v25 = vor.u32 %v1077_v17, %v856_v16  ;;  %v861_v26 = vor.u32 %v1076_v18, %v858_v19 }
  0x1f   :  { %v1070_v23 = vld [vmem:[#allocation2 + $0x4] sm:$0xf]  ;;  %v834_v24 = vld [vmem:[#allocation2 + $0xc] sm:$0xf0]  ;;  %v833_v27 = vor.u32 %v1071_v22, %v832_v21  ;;  %v1103_v30 = vld [vmem:[#allocation5 + $0xa8] sm:$0xff] }
  0x20   :  { %1132 = vmatpush.bf16.msra.mxu2 %v1087_v4  ;;  %389 = vmatpush.bf16.msra.mxu0 %v1087_v4  ;;  %v1104_v28 = vld [vmem:[#allocation5 + $0xb0] sm:$0xff]  ;;  %v837_v29 = vor.u32 %v1070_v23, %v834_v24  ;;  %v1102_v31 = vld [vmem:[#allocation5 + $0xa0] sm:$0xff]  ;;  %v868_v32 = vld [vmem:[#allocation2 + $0x48] sm:$0xf] }
  0x21   :  { %1140 = vmatpush.bf16.msra.mxu3 %v1095_v5  ;;  %418 = vmatpush.bf16.msra.mxu1 %v1095_v5  ;;  %v1080_v33 = vld [vmem:[#allocation2 + $0x50] sm:$0xf0]  ;;  %v1079_v34 = vld [vmem:[#allocation2 + $0x4c] sm:$0xf]  ;;  %v870_v35 = vld [vmem:[#allocation2 + $0x54] sm:$0xf0] }
  0x22   :  { %v1101_v36 = vld [vmem:[#allocation5 + $0x98] sm:$0xff]  ;;  %v1074_v38 = vld [vmem:[#allocation2 + $0x20] sm:$0xf0]  ;;  %v846_v40 = vld [vmem:[#allocation2 + $0x24] sm:$0xf0]  ;;  %v869_v41 = vor.u32 %v1080_v33, %v868_v32  ;;  %v873_v42 = vor.u32 %v1079_v34, %v870_v35 }
  0x23   :  { %v844_v37 = vld [vmem:[#allocation2 + $0x18] sm:$0xf]  ;;  %v1073_v39 = vld [vmem:[#allocation2 + $0x1c] sm:$0xf]  ;;  %v1100_v44 = vld [vmem:[#allocation5 + $0x90] sm:$0xff] }
  0x24   :  { %1133 = vmatpush.bf16.msra.mxu2 %v1086_v6  ;;  %390 = vmatpush.bf16.msra.mxu0 %v1086_v6  ;;  %v845_v43 = vor.u32 %v1074_v38, %v844_v37  ;;  %v849_v45 = vor.u32 %v1073_v39, %v846_v40  ;;  %v1099_v46 = vld [vmem:[#allocation5 + $0x88] sm:$0xff]  ;;  %v1098_v47 = vld [vmem:[#allocation5 + $0x80] sm:$0xff]  ;;  %v1072_v49 = vld [vmem:[#allocation2 + $0x10] sm:$0xf0] }
  0x25   :  { %1141 = vmatpush.bf16.msra.mxu3 %v1094_v7  ;;  %419 = vmatpush.bf16.msra.mxu1 %v1094_v7  ;;  %v840_v48 = vld [vmem:[#allocation2 + $0x8] sm:$0xf]  ;;  %v852_v51 = vld [vmem:[#allocation2 + $0x20] sm:$0xf]  ;;  %v1075_v52 = vld [vmem:[#allocation2 + $0x28] sm:$0xf0] }
  0x26   :  { %v841_v50 = vor.u32 %v1072_v49, %v840_v48  ;;  %v853_v53 = vor.u32 %v1075_v52, %v852_v51  ;;  %v864_v54 = vld [vmem:[#allocation2 + $0x38] sm:$0xf]  ;;  %v1078_v55 = vld [vmem:[#allocation2 + $0x40] sm:$0xf0]  ;;  %v876_v57 = vld [vmem:[#allocation2 + $0x50] sm:$0xf] }
  0x27   :  { %v865_v56 = vor.u32 %v1078_v55, %v864_v54  ;;  %v1081_v58 = vld [vmem:[#allocation2 + $0x58] sm:$0xf0]  ;;  %v1112_v61 = vld [vmem:[#allocation7 + $0x30] sm:$0xff]  ;;  %v1111_v62 = vld [vmem:[#allocation7 + $0x28] sm:$0xff] }
  0x28   :  { %1134 = vmatpush.bf16.msra.mxu2 %v1085_v8  ;;  %391 = vmatpush.bf16.msra.mxu0 %v1085_v8  ;;  %v877_v59 = vor.u32 %v1081_v58, %v876_v57  ;;  %v1113_v60 = vld [vmem:[#allocation7 + $0x38] sm:$0xff]  ;;  %v1110_v63 = vld [vmem:[#allocation7 + $0x20] sm:$0xff]  ;;  %v1108_v2 = vld [vmem:[#allocation7 + $0x10] sm:$0xff] }
  0x29   :  { %1142 = vmatpush.bf16.msra.mxu3 %v1093_v9  ;;  %420 = vmatpush.bf16.msra.mxu1 %v1093_v9  ;;  %v1109_v0 = vld [vmem:[#allocation7 + $0x18] sm:$0xff]  ;;  %v1107_v3 = vld [vmem:[#allocation7 + $0x8] sm:$0xff]  ;;  %v1106_v5 = vld [vmem:[#allocation7] sm:$0xff] }
  0x2a   :  { %v1121_v40 = vld [vmem:[#allocation8 + $0x38] sm:$0xff]  ;;  %v1118_v52 = vld [vmem:[#allocation8 + $0x20] sm:$0xff] }
  0x2b   :  { %v1117_v57 = vld [vmem:[#allocation8 + $0x18] sm:$0xff] }
  0x2c   :  { %1135 = vmatpush.bf16.msra.mxu2 %v1084_v10  ;;  %392 = vmatpush.bf16.msra.mxu0 %v1084_v10 }
  0x2d   :  { %1143 = vmatpush.bf16.msra.mxu3 %v1092_v11  ;;  %421 = vmatpush.bf16.msra.mxu1 %v1092_v11  ;;  %v1158_v11 = vld [vmem:[%s1420_s2] ss:$0 sm:$0xff] }
  0x30   :  { %1136 = vmatpush.bf16.msra.mxu2 %v1083_v12  ;;  %393 = vmatpush.bf16.msra.mxu0 %v1083_v12 }
  0x31   :  { %1144 = vmatpush.bf16.msra.mxu3 %v1091_v13  ;;  %422 = vmatpush.bf16.msra.mxu1 %v1091_v13 }
  0x34   :  { %1137 = vmatpush.bf16.msra.mxu2 %v1082_v14  ;;  %394 = vmatpush.bf16.msra.mxu0 %v1082_v14 }
  0x35   :  { %1145 = vmatpush.bf16.msra.mxu3 %v1090_v15  ;;  %423 = vmatpush.bf16.msra.mxu1 %v1090_v15 }
  0x37   :  { %405 = vmatmul.bf16.vlgmr.msra.gmra.mxu2 %v857_v25  ;;  %395 = vmatmul.bf16.vlgmr.msra.gmra.mxu0 %v833_v27 }
  0x38   :  { %445 = vmatpush.bf16.msrb.mxu2 %v1105_v20  ;;  %434 = vmatmul.bf16.vlgmr.msra.gmra.mxu3 %v861_v26 }
  0x39   :  { %424 = vmatmul.bf16.vlgmr.msra.gmra.mxu1 %v837_v29  ;;  %554 = vmatpush.bf16.msrb.mxu3 %v1113_v60 }
  0x3a   :  { %663 = vmatpush.bf16.msrb.mxu0 %v1121_v40 }
  0x3c   :  { %446 = vmatpush.bf16.msrb.mxu2 %v1104_v28 }
  0x3d   :  { %555 = vmatpush.bf16.msrb.mxu3 %v1112_v61 }
  0x40   :  { %447 = vmatpush.bf16.msrb.mxu2 %v1103_v30 }
  0x41   :  { %556 = vmatpush.bf16.msrb.mxu3 %v1111_v62 }
  0x44   :  { %448 = vmatpush.bf16.msrb.mxu2 %v1102_v31 }
  0x45   :  { %557 = vmatpush.bf16.msrb.mxu3 %v1110_v63 }
  0x47   :  { %410 = vmatmul.bf16.gmra.mxu2 %v869_v41  ;;  %400 = vmatmul.bf16.gmra.mxu0 %v845_v43 }
  0x48   :  { %449 = vmatpush.bf16.msrb.mxu2 %v1101_v36  ;;  %439 = vmatmul.bf16.gmra.mxu3 %v873_v42 }
  0x49   :  { %429 = vmatmul.bf16.gmra.mxu1 %v849_v45  ;;  %558 = vmatpush.bf16.msrb.mxu3 %v1109_v0 }
  0x4c   :  { %450 = vmatpush.bf16.msrb.mxu2 %v1100_v44  ;;  %v1120_v44 = vld [vmem:[#allocation8 + $0x30] sm:$0xff] }
  0x4d   :  { %559 = vmatpush.bf16.msrb.mxu3 %v1108_v2  ;;  %664 = vmatpush.bf16.msrb.mxu0 %v1120_v44  ;;  %v1123_v44 = vld [vmem:[#allocation10 + $0x8] sm:$0xff] }
  0x50   :  { %451 = vmatpush.bf16.msrb.mxu2 %v1099_v46 }
  0x51   :  { %560 = vmatpush.bf16.msrb.mxu3 %v1107_v3 }
  0x54   :  { %452 = vmatpush.bf16.msrb.mxu2 %v1098_v47  ;;  %v1119_v47 = vld [vmem:[#allocation8 + $0x28] sm:$0xff] }
  0x55   :  { %561 = vmatpush.bf16.msrb.mxu3 %v1106_v5  ;;  %665 = vmatpush.bf16.msrb.mxu0 %v1119_v47  ;;  %v1160_v47 = vld [vmem:[%s1424_s6] ss:$0 sm:$0xff] }
  0x57   :  { %453 = vmatmul.bf16.vlgmr.msrb.gmra.mxu2 %v841_v50 }
  0x59   :  { %666 = vmatpush.bf16.msrb.mxu0 %v1118_v52 }
  0x5d   :  { %667 = vmatpush.bf16.msrb.mxu0 %v1117_v57 }
  0x67   :  { %458 = vmatmul.bf16.gmra.mxu2 %v853_v53 }
  0x77   :  { %463 = vmatmul.bf16.gmra.mxu2 %v865_v56 }
  0x87   :  { %468 = vmatmul.bf16.gmra.mxu2 %v877_v59 }
  0xb4   :  { %v396_v7 = vpop.f32.mrf.mxu0 }
  0xb5   :  { %v397_v12 = vadd.f32 %v1158_v11, %v396_v7  ;;  %v1116_v7 = vld [vmem:[#allocation8 + $0x10] sm:$0xff] }
  0xb6   :  { %v425_v8 = vpop.f32.mrf.mxu1  ;;  %668 = vmatpush.bf16.msrb.mxu0 %v1116_v7 }
  0xb7   :  { %v426_v15 = vadd.f32 %v425_v8, %v397_v12  ;;  %v1115_v8 = vld [vmem:[#allocation8 + $0x8] sm:$0xff] }
  0xba   :  { %v406_v1 = vpop.f32.mrf.mxu2  ;;  %669 = vmatpush.bf16.msrb.mxu0 %v1115_v8 }
  0xbb   :  { %v435_v32 = vpop.f32.mrf.mxu3  ;;  %v407_v43 = vadd.f32 %v1158_v11, %v406_v1 }
  0xbc   :  { %v398_v10 = vpop.f32.mrf.mxu0 }
  0xbd   :  { %v399_v16 = vadd.f32 %v1158_v11, %v398_v10  ;;  %v436_v46 = vadd.f32 %v435_v32, %v407_v43  ;;  %v1114_v10 = vld [vmem:[#allocation8] sm:$0xff]  ;;  %v1124_v43 = vld [vmem:[#allocation10 + $0x10] sm:$0xff] }
  0xbe   :  { %v427_v13 = vpop.f32.mrf.mxu1  ;;  %670 = vmatpush.bf16.msrb.mxu0 %v1114_v10 }
  0xbf   :  { %v428_v18 = vadd.f32 %v427_v13, %v399_v16 }
  0xc2   :  { %v408_v4 = vpop.f32.mrf.mxu2 }
  0xc3   :  { %v437_v41 = vpop.f32.mrf.mxu3  ;;  %v409_v45 = vadd.f32 %v1158_v11, %v408_v4 }
  0xc4   :  { %v401_v17 = vpop.f32.mrf.mxu0 }
  0xc5   :  { %v402_v26 = vadd.f32 %v1158_v11, %v401_v17  ;;  %v438_v48 = vadd.f32 %v437_v41, %v409_v45  ;;  %v1122_v45 = vld [vmem:[#allocation10] sm:$0xff] }
  0xc6   :  { %v430_v22 = vpop.f32.mrf.mxu1 }
  0xc7   :  { %v431_v29 = vadd.f32 %v430_v22, %v402_v26  ;;  %v1128_v26 = vld [vmem:[#allocation10 + $0x30] sm:$0xff] }
  0xca   :  { %v411_v6 = vpop.f32.mrf.mxu2 }
  0xcb   :  { %v440_v53 = vpop.f32.mrf.mxu3  ;;  %v412_v59 = vadd.f32 %v1158_v11, %v411_v6  ;;  %v1159_v6 = vld [vmem:[%s1422_s4] ss:$0 sm:$0xff] }
  0xcc   :  { %v403_v27 = vpop.f32.mrf.mxu0 }
  0xcd   :  { %v404_v30 = vadd.f32 %v1158_v11, %v403_v27  ;;  %v441_v62 = vadd.f32 %v440_v53, %v412_v59  ;;  %v1127_v27 = vld [vmem:[#allocation10 + $0x28] sm:$0xff] }
  0xce   :  { %v432_v31 = vpop.f32.mrf.mxu1 }
  0xcf   :  { %v433_v33 = vadd.f32 %v432_v31, %v404_v30  ;;  %v1126_v31 = vld [vmem:[#allocation10 + $0x20] sm:$0xff] }
  0xd2   :  { %v413_v9 = vpop.f32.mrf.mxu2 }
  0xd3   :  { %v414_v60 = vadd.f32 %v1158_v11, %v413_v9  ;;  %v442_v61 = vpop.f32.mrf.mxu3 }
  0xd5   :  { %v443_v63 = vadd.f32 %v442_v61, %v414_v60 }
  0xda   :  { %v454_v14 = vpop.f32.mrf.mxu2 }
  0xdb   :  { %v455_v19 = vadd.f32 %v454_v14, %v426_v15 }
  0xdd   :  { %v474_v23 = vmax.f32 %v455_v19, 0.0 }
  0xe2   :  { %v456_v20 = vpop.f32.mrf.mxu2 }
  0xe3   :  { %v457_v21 = vadd.f32 %v456_v20, %v428_v18 }
  0xe5   :  { %v475_v24 = vmax.f32 %v457_v21, 0.0 }
  0xe7   :  { %v482_v25 = vpack.c.bf16 %v475_v24, %v474_v23  ;;  %v1129_v24 = vld [vmem:[#allocation10 + $0x38] sm:$0xff] }
  0xe8   :  { %772 = vmatpush.bf16.msrb.mxu1 %v1129_v24 }
  0xe9   :  { %562 = vmatmul.bf16.vlgmr.msrb.gmra.mxu3 %v482_v25 }
  0xea   :  { %v459_v28 = vpop.f32.mrf.mxu2 }
  0xeb   :  { %v460_v34 = vadd.f32 %v459_v28, %v431_v29 }
  0xec   :  { %773 = vmatpush.bf16.msrb.mxu1 %v1128_v26 }
  0xed   :  { %v476_v37 = vmax.f32 %v460_v34, 0.0 }
  0xf0   :  { %774 = vmatpush.bf16.msrb.mxu1 %v1127_v27 }
  0xf2   :  { %v461_v35 = vpop.f32.mrf.mxu2 }
  0xf3   :  { %v462_v36 = vadd.f32 %v461_v35, %v433_v33  ;;  %v1125_v35 = vld [vmem:[#allocation10 + $0x18] sm:$0xff] }
  0xf4   :  { %775 = vmatpush.bf16.msrb.mxu1 %v1126_v31 }
  0xf5   :  { %v477_v38 = vmax.f32 %v462_v36, 0.0 }
  0xf7   :  { %v483_v39 = vpack.c.bf16 %v477_v38, %v476_v37 }
  0xf8   :  { %776 = vmatpush.bf16.msrb.mxu1 %v1125_v35 }
  0xf9   :  { %567 = vmatmul.bf16.gmra.mxu3 %v483_v39 }
  0xfa   :  { %v464_v42 = vpop.f32.mrf.mxu2 }
  0xfb   :  { %v465_v49 = vadd.f32 %v464_v42, %v436_v46 }
  0xfc   :  { %777 = vmatpush.bf16.msrb.mxu1 %v1124_v43 }
  0xfd   :  { %v478_v54 = vmax.f32 %v465_v49, 0.0 }
 0x100   :  { %778 = vmatpush.bf16.msrb.mxu1 %v1123_v44 }
 0x102   :  { %v466_v50 = vpop.f32.mrf.mxu2 }
 0x103   :  { %v467_v51 = vadd.f32 %v466_v50, %v438_v48 }
 0x104   :  { %779 = vmatpush.bf16.msrb.mxu1 %v1122_v45 }
 0x105   :  { %v479_v55 = vmax.f32 %v467_v51, 0.0 }
 0x107   :  { %v484_v56 = vpack.c.bf16 %v479_v55, %v478_v54 }
 0x109   :  { %572 = vmatmul.bf16.gmra.mxu3 %v484_v56 }
 0x10a   :  { %v469_v58 = vpop.f32.mrf.mxu2 }
 0x10b   :  { %v470_v0 = vadd.f32 %v469_v58, %v441_v62 }
 0x10d   :  { %v480_v3 = vmax.f32 %v470_v0, 0.0 }
 0x112   :  { %v471_v1 = vpop.f32.mrf.mxu2 }
 0x113   :  { %v472_v2 = vadd.f32 %v471_v1, %v443_v63 }
 0x115   :  { %v481_v4 = vmax.f32 %v472_v2, 0.0 }
 0x117   :  { %v485_v5 = vpack.c.bf16 %v481_v4, %v480_v3 }
 0x119   :  { %577 = vmatmul.bf16.gmra.mxu3 %v485_v5 }
 0x16c   :  { %v563_v12 = vpop.f32.mrf.mxu3 }
 0x16d   :  { %v564_v9 = vadd.f32 %v1159_v6, %v563_v12 }
 0x16f   :  { %v583_v14 = vmax.f32 %v564_v9, 0.0  ;;  %v1161_v9 = vld [vmem:[%s1426_s8] ss:$0 sm:$0xff]  ;;  %s1323_s8 = smov [#allocation11]  }
 0x170   :  { %s813_s17 = sshll.u32 %s1323_s8, 4  ;;  %s814_s17 = int_to_ptr.vmem [resolvable:$true] %s813_s17 }
 0x174   :  { %v565_v11 = vpop.f32.mrf.mxu3 }
 0x175   :  { %v566_v13 = vadd.f32 %v1159_v6, %v565_v11 }
 0x177   :  { %v584_v15 = vmax.f32 %v566_v13, 0.0 }
 0x179   :  { %v591_v16 = vpack.c.bf16 %v584_v15, %v583_v14 }
 0x17b   :  { %671 = vmatmul.bf16.vlgmr.msrb.gmra.mxu0 %v591_v16 }
 0x17c   :  { %v568_v17 = vpop.f32.mrf.mxu3 }
 0x17d   :  { %v569_v18 = vadd.f32 %v1159_v6, %v568_v17 }
 0x17f   :  { %v585_v21 = vmax.f32 %v569_v18, 0.0 }
 0x184   :  { %v570_v19 = vpop.f32.mrf.mxu3 }
 0x185   :  { %v571_v20 = vadd.f32 %v1159_v6, %v570_v19 }
 0x187   :  { %v586_v22 = vmax.f32 %v571_v20, 0.0 }
 0x189   :  { %v592_v23 = vpack.c.bf16 %v586_v22, %v585_v21 }
 0x18b   :  { %676 = vmatmul.bf16.gmra.mxu0 %v592_v23 }
 0x18c   :  { %v573_v25 = vpop.f32.mrf.mxu3 }
 0x18d   :  { %v574_v28 = vadd.f32 %v1159_v6, %v573_v25 }
 0x18f   :  { %v587_v32 = vmax.f32 %v574_v28, 0.0 }
 0x194   :  { %v575_v29 = vpop.f32.mrf.mxu3 }
 0x195   :  { %v576_v30 = vadd.f32 %v1159_v6, %v575_v29 }
 0x197   :  { %v588_v33 = vmax.f32 %v576_v30, 0.0 }
 0x199   :  { %v593_v34 = vpack.c.bf16 %v588_v33, %v587_v32 }
 0x19b   :  { %681 = vmatmul.bf16.gmra.mxu0 %v593_v34 }
 0x19c   :  { %v578_v36 = vpop.f32.mrf.mxu3 }
 0x19d   :  { %v579_v37 = vadd.f32 %v1159_v6, %v578_v36 }
 0x19f   :  { %v589_v40 = vmax.f32 %v579_v37, 0.0 }
 0x1a4   :  { %v580_v38 = vpop.f32.mrf.mxu3 }
 0x1a5   :  { %v581_v39 = vadd.f32 %v1159_v6, %v580_v38 }
 0x1a7   :  { %v590_v41 = vmax.f32 %v581_v39, 0.0 }
 0x1a9   :  { %v594_v42 = vpack.c.bf16 %v590_v41, %v589_v40 }
 0x1ab   :  { %686 = vmatmul.bf16.gmra.mxu0 %v594_v42 }
 0x1f8   :  { %v672_v46 = vpop.f32.mrf.mxu0 }
 0x1f9   :  { %v673_v48 = vadd.f32 %v1160_v47, %v672_v46 }
 0x1fb   :  { %v692_v51 = vmax.f32 %v673_v48, 0.0 }
 0x200   :  { %v674_v49 = vpop.f32.mrf.mxu0 }
 0x201   :  { %v675_v50 = vadd.f32 %v1160_v47, %v674_v49 }
 0x203   :  { %v693_v52 = vmax.f32 %v675_v50, 0.0 }
 0x205   :  { %v700_v53 = vpack.c.bf16 %v693_v52, %v692_v51 }
 0x207   :  { %780 = vmatmul.bf16.vlgmr.msrb.gmra.mxu1 %v700_v53 }
 0x208   :  { %v677_v54 = vpop.f32.mrf.mxu0 }
 0x209   :  { %v678_v55 = vadd.f32 %v1160_v47, %v677_v54 }
 0x20b   :  { %v694_v58 = vmax.f32 %v678_v55, 0.0 }
 0x210   :  { %v679_v56 = vpop.f32.mrf.mxu0 }
 0x211   :  { %v680_v57 = vadd.f32 %v1160_v47, %v679_v56 }
 0x213   :  { %v695_v59 = vmax.f32 %v680_v57, 0.0 }
 0x215   :  { %v701_v60 = vpack.c.bf16 %v695_v59, %v694_v58 }
 0x217   :  { %785 = vmatmul.bf16.gmra.mxu1 %v701_v60 }
 0x218   :  { %v682_v61 = vpop.f32.mrf.mxu0 }
 0x219   :  { %v683_v62 = vadd.f32 %v1160_v47, %v682_v61 }
 0x21b   :  { %v696_v1 = vmax.f32 %v683_v62, 0.0 }
 0x220   :  { %v684_v63 = vpop.f32.mrf.mxu0 }
 0x221   :  { %v685_v0 = vadd.f32 %v1160_v47, %v684_v63 }
 0x223   :  { %v697_v2 = vmax.f32 %v685_v0, 0.0 }
 0x225   :  { %v702_v3 = vpack.c.bf16 %v697_v2, %v696_v1 }
 0x227   :  { %790 = vmatmul.bf16.gmra.mxu1 %v702_v3 }
 0x228   :  { %v687_v4 = vpop.f32.mrf.mxu0 }
 0x229   :  { %v688_v5 = vadd.f32 %v1160_v47, %v687_v4 }
 0x22b   :  { %v698_v10 = vmax.f32 %v688_v5, 0.0 }
 0x230   :  { %v689_v7 = vpop.f32.mrf.mxu0 }
 0x231   :  { %v690_v8 = vadd.f32 %v1160_v47, %v689_v7 }
 0x233   :  { %v699_v12 = vmax.f32 %v690_v8, 0.0 }
 0x235   :  { %v703_v6 = vpack.c.bf16 %v699_v12, %v698_v10 }
 0x237   :  { %795 = vmatmul.bf16.gmra.mxu1 %v703_v6 }
 0x284   :  { %v781_v11 = vpop.f32.mrf.mxu1 }
 0x285   :  { %v782_v13 = vadd.f32 %v1161_v9, %v781_v11 }
 0x287   :  { %801 = vst [vmem:[#allocation11] sm:$0xff] %v782_v13 }
 0x28c   :  { %v783_v14 = vpop.f32.mrf.mxu1 }
 0x28d   :  { %v784_v15 = vadd.f32 %v1161_v9, %v783_v14 }
 0x28f   :  { %802 = vst [vmem:[#allocation11 + $0x8] sm:$0xff] %v784_v15 }
 0x294   :  { %v786_v16 = vpop.f32.mrf.mxu1 }
 0x295   :  { %v787_v17 = vadd.f32 %v1161_v9, %v786_v16 }
 0x297   :  { %803 = vst [vmem:[#allocation11 + $0x10] sm:$0xff] %v787_v17 }
 0x29c   :  { %v788_v18 = vpop.f32.mrf.mxu1 }
 0x29d   :  { %v789_v19 = vadd.f32 %v1161_v9, %v788_v18 }
 0x29f   :  { %804 = vst [vmem:[#allocation11 + $0x18] sm:$0xff] %v789_v19 }
 0x2a4   :  { %v791_v20 = vpop.f32.mrf.mxu1 }
 0x2a5   :  { %v792_v21 = vadd.f32 %v1161_v9, %v791_v20 }
 0x2a7   :  { %805 = vst [vmem:[#allocation11 + $0x20] sm:$0xff] %v792_v21 }
 0x2ac   :  { %v793_v22 = vpop.f32.mrf.mxu1 }
 0x2ad   :  { %v794_v23 = vadd.f32 %v1161_v9, %v793_v22 }
 0x2af   :  { %806 = vst [vmem:[#allocation11 + $0x28] sm:$0xff] %v794_v23 }
 0x2b4   :  { %v796_v24 = vpop.f32.mrf.mxu1 }
 0x2b5   :  { %v797_v25 = vadd.f32 %v1161_v9, %v796_v24 }
 0x2b7   :  { %807 = vst [vmem:[#allocation11 + $0x30] sm:$0xff] %v797_v25 }
 0x2bc   :  { %v798_v26 = vpop.f32.mrf.mxu1 }
 0x2bd   :  { %v799_v27 = vadd.f32 %v1161_v9, %v798_v26 }
 0x2bf   :  { %808 = vst [vmem:[#allocation11 + $0x38] sm:$0xff] %v799_v27 }
 0x2c0   :  { %821 = dma.vmem_to_hbm [thread:$0]  %s814_s17, 1024, %s816_s20, [#allocation4], %s1324_s21, %s1324_s21, %s1325_s1  }
 0x2c1   :  { %1312 = dma.done.wait [#allocation4], 1024  }
 0x2c2   :  { %1313 = vsyncadd [#allocation4], 4294966272 }
 0x2c3   :  { %826 = vsyncpa [#allocation3], 1 }
 0x2c4   :  { %827 = vsyncpa [#allocation6], 1 }
 0x2c5   :  { %828 = vsyncpa [#allocation9], 1 }
 0x2c6   :  { %829 = vsyncpa [#allocation4], 1 }

</bundles_post_ra>
